<compile_context>
chip_gen: v6e
topology: v6e:2x2x1
jax: 0.10.0
libtpu: 0.0.40
codegen_flags: <defaults>
</compile_context>

<pallas_src>
import jax
import jax.numpy as jnp
from jax import lax
from jax.experimental import pallas as pl
from jax.experimental.pallas import tpu as pltpu


def _sigmoid(x):
    # Exactly sigmoid, but guaranteed single tanh EUP op (no exp + divide).
    return 0.5 * (jnp.tanh(0.5 * x) + 1.0)


# -----------------------------------------------------------------------------
# Kernels
# -----------------------------------------------------------------------------
def _cell_kernel(x_ref, h_ref, wtop_ref, ubot_ref, bcat_ref, y_ref, h_out_ref):
    """One IntersectionRNN step (no staging scratch; two direct MXU dots)."""
    I = x_ref.shape[1]
    H = h_ref.shape[1]

    x = x_ref[...]                       # (B, I) f32
    h = h_ref[...]                       # (B, H) f32

    pre = (jnp.dot(x.astype(jnp.bfloat16), wtop_ref[...],
                   preferred_element_type=jnp.float32)
           + jnp.dot(h, ubot_ref[...], preferred_element_type=jnp.float32)
           + bcat_ref[...])

    # Column layout: [y_in (I) | h_in (H) | g_y (I) | g_h (H)]
    y_in = jnp.tanh(pre[:, :I])
    h_in = jnp.tanh(pre[:, I:I + H])
    g_y = _sigmoid(pre[:, I + H:2 * I + H])
    g_h = _sigmoid(pre[:, 2 * I + H:])

    y_ref[...] = g_y * x + (1.0 - g_y) * y_in
    h_out_ref[...] = g_h * h + (1.0 - g_h) * h_in


def _xproj_kernel(x_ref, wtop_ref, bcat_ref, o_ref):
    """Parallel (non-recurrent) projection: pre_x = x @ W_top + b_cat."""
    o_ref[...] = (jnp.dot(x_ref[...], wtop_ref[...],
                          preferred_element_type=jnp.float32)
                  + bcat_ref[...])


def _seq_kernel(px_ref, x_ref, ubot_ref, h0_ref, y_ref, h_ref):
    """Recurrent part over a T_CHUNK time slab.

    px_ref : (Tc, B, N)  f32  precomputed x@W_top + b
    x_ref  : (Tc, B, I)  bf16 inputs (needed for the g_y*x blend)
    ubot_ref: (H, N)     f32  recurrent weights (VMEM-resident across grid)
    h0_ref : (B, H)      f32  initial hidden state (resident)
    y_ref  : (Tc, B, I)  f32  outputs for this slab
    h_ref  : (B, H)      f32  carried hidden state (constant index_map =>
                              VMEM-resident accumulator; final value flushed)
    """
    Tc, _, I = x_ref.shape
    H = h_ref.shape[1]

    @pl.when(pl.program_id(0) == 0)
    def _():
        h_ref[...] = h0_ref[...]

    u = ubot_ref[...]                    # hoist the (H, N) weight load

    def step(i, h):
        pre = px_ref[i] + jnp.dot(h, u, preferred_element_type=jnp.float32)
        y_in = jnp.tanh(pre[:, :I])
        h_in = jnp.tanh(pre[:, I:I + H])
        g_y = _sigmoid(pre[:, I + H:2 * I + H])
        g_h = _sigmoid(pre[:, 2 * I + H:])
        x = x_ref[i].astype(jnp.float32)
        y_ref[i] = g_y * x + (1.0 - g_y) * y_in
        return g_h * h + (1.0 - g_h) * h_in

    h_ref[...] = lax.fori_loop(0, Tc, step, h_ref[...], unroll=True)


# -----------------------------------------------------------------------------
# Wrappers
# -----------------------------------------------------------------------------
def intersection_rnn_cell(x_t, h_prev, packed):
    """One forward step. Returns (y_t, h_t).

    NOTE: do not call this in an external per-timestep loop (it reloads the
    weights every call) -- use intersection_rnn_sequence for sequences.
    """
    B, I = x_t.shape
    H = h_prev.shape[1]
    vmem = pl.BlockSpec(memory_space=pltpu.MemorySpace.VMEM)

    y_t, h_t = pl.pallas_call(
        _cell_kernel,
        out_shape=(
            jax.ShapeDtypeStruct((B, I), jnp.float32),
            jax.ShapeDtypeStruct((B, H), jnp.float32),
        ),
        in_specs=[vmem] * 5,
        out_specs=(vmem, vmem),
    )(x_t, h_prev, packed["W_top"], packed["U_bot"], packed["b_cat"])
    return y_t, h_t


def _x_projection(xs_bf, wtop, bcat):
    """pre_x = reshape(xs, (T*B, I)) @ W_top + b_cat as one parallel matmul."""
    T, B, I = xs_bf.shape
    N = wtop.shape[1]
    M = T * B
    xs_flat = xs_bf.reshape(M, I)
    TM = M if M <= 256 else 256          # demo sizes: single block

    pre = pl.pallas_call(
        _xproj_kernel,
        out_shape=jax.ShapeDtypeStruct((M, N), jnp.float32),
        grid=(pl.cdiv(M, TM),),
        in_specs=[
            pl.BlockSpec((TM, I), lambda m: (m, 0)),
            pl.BlockSpec((I, N), lambda m: (0, 0)),
            pl.BlockSpec((1, N), lambda m: (0, 0)),
        ],
        out_specs=pl.BlockSpec((TM, N), lambda m: (m, 0)),
        compiler_params=pltpu.CompilerParams(
            dimension_semantics=("parallel",)),
    )(xs_flat, wtop, bcat)
    return pre.reshape(T, B, N)


def intersection_rnn_sequence(xs, packed, h0=None, t_chunk=None):
    """Run the cell over xs: (T, B, I) starting from h0 (zeros = reset()).

    The recurrent weights U_bot and the carried hidden state stay
    VMEM-resident across all grid steps; T_CHUNK timesteps are processed per
    grid step with a fully unrolled inner loop.
    Returns (ys: (T, B, I) f32, h_last: (B, H) f32).
    """
    T, B, I = xs.shape
    H = packed["hidden_size"]
    N = 2 * (I + H)
    if h0 is None:
        h0 = jnp.zeros((B, H), jnp.float32)

    xs_bf = xs.astype(jnp.bfloat16)                    # cast once in wrapper
    pre_x = _x_projection(xs_bf, packed["W_top"], packed["b_cat"])  # (T,B,N)

    if t_chunk is None:
        t_chunk = next(c for c in (8, 4, 2, 1) if T % c == 0)
    assert T % t_chunk == 0, "t_chunk must divide T"
    n_chunks = T // t_chunk

    ys, h_last = pl.pallas_call(
        _seq_kernel,
        out_shape=(
            jax.ShapeDtypeStruct((T, B, I), jnp.float32),
            jax.ShapeDtypeStruct((B, H), jnp.float32),
        ),
        grid=(n_chunks,),
        in_specs=[
            pl.BlockSpec((t_chunk, B, N), lambda c: (c, 0, 0)),  # pre_x slab
            pl.BlockSpec((t_chunk, B, I), lambda c: (c, 0, 0)),  # x slab (bf16)
            pl.BlockSpec((H, N), lambda c: (0, 0)),              # resident U
            pl.BlockSpec((B, H), lambda c: (0, 0)),              # resident h0
        ],
        out_specs=(
            pl.BlockSpec((t_chunk, B, I), lambda c: (c, 0, 0)),  # y slab
            pl.BlockSpec((B, H), lambda c: (0, 0)),              # carried h
        ),
        # Recurrence => sequential grid.  For much larger I/H add
        # vmem_limit_bytes=... here (and N-tile U_bot on v7x's 64 MiB VMEM).
        compiler_params=pltpu.CompilerParams(
            dimension_semantics=("arbitrary",)),
    )(pre_x, xs_bf, packed["U_bot"], h0)
    return ys, h_last


# -----------------------------------------------------------------------------
# Parameter init (mirrors the PyTorch module) + packing
# -----------------------------------------------------------------------------
def _xavier_normal(key, shape):
    fan_in, fan_out = shape
    std = (2.0 / (fan_in + fan_out)) ** 0.5
    return std * jax.random.normal(key, shape, dtype=jnp.float32)


def _orthogonal(key, shape):
    return jax.nn.initializers.orthogonal()(key, shape, jnp.float32)


def pack_params(p):
    """Concatenate per-gate weights/biases once, at init time (not per step).

    Column layout of W_top / U_bot / b_cat: [y_in (I) | h_in (H) | g_y (I) | g_h (H)]
    """
    w_top = jnp.concatenate(
        [p["W_yin"], p["W_hin"], p["W_gy"], p["W_gh"]],
        axis=1).astype(jnp.bfloat16)                        # (I, 2I+2H) bf16
    u_bot = jnp.concatenate(
        [p["U_yin"], p["U_hin"], p["U_gy"], p["U_gh"]], axis=1)  # (H, 2I+2H) f32
    b_cat = jnp.concatenate(
        [p["b_yin"], p["b_hin"], p["b_gy"], p["b_gh"]]).reshape(1, -1)  # f32
    return {
        "W_top": w_top,                       # parallel path, bf16
        "U_bot": u_bot,                       # recurrent path, f32 (orthogonal)
        "b_cat": b_cat,
        "input_size": p["W_yin"].shape[0],
        "hidden_size": p["U_hin"].shape[0],
    }


def init_params(key, input_size, hidden_size):
    ks = jax.random.split(key, 8)
    raw = {
        "W_yin": _xavier_normal(ks[0], (input_size, input_size)),
        "W_hin": _xavier_normal(ks[1], (input_size, hidden_size)),
        "W_gy":  _xavier_normal(ks[2], (input_size, input_size)),
        "W_gh":  _xavier_normal(ks[3], (input_size, hidden_size)),
        "U_yin": _orthogonal(ks[4], (hidden_size, input_size)),
        "U_hin": _orthogonal(ks[5], (hidden_size, hidden_size)),
        "U_gy":  _orthogonal(ks[6], (hidden_size, input_size)),
        "U_gh":  _orthogonal(ks[7], (hidden_size, hidden_size)),
        "b_yin": jnp.zeros((input_size,), jnp.float32),
        "b_hin": jnp.zeros((hidden_size,), jnp.float32),
        "b_gy":  jnp.zeros((input_size,), jnp.float32),
        "b_gh":  jnp.zeros((hidden_size,), jnp.float32),
    }
    return raw, pack_params(raw)


# -----------------------------------------------------------------------------
# Pure-JAX f32 reference (mirrors the PyTorch forward) for validation
# -----------------------------------------------------------------------------
def _reference_step(x_t, h_prev, p):
    y_in = jnp.tanh(x_t @ p["W_yin"] + h_prev @ p["U_yin"] + p["b_yin"])
    h_in = jnp.tanh(x_t @ p["W_hin"] + h_prev @ p["U_hin"] + p["b_hin"])
    g_y = jax.nn.sigmoid(x_t @ p["W_gy"] + h_prev @ p["U_gy"] + p["b_gy"])
    g_h = jax.nn.sigmoid(x_t @ p["W_gh"] + h_prev @ p["U_gh"] + p["b_gh"])
    y_t = g_y * x_t + (g_y - 1.0) * -1.0 * y_in
    h_t = g_h * h_prev + (g_h - 1.0) * -1.0 * h_in
    return y_t, h_t


if __name__ == "__main__":
    batch = 8
    input_size = 128
    hidden_size = 128
    seq_len = 8

    key = jax.random.PRNGKey(0)
    k_param, k_x = jax.random.split(key)
    raw_params, packed = init_params(k_param, input_size, hidden_size)

    xs = jax.random.normal(k_x, (seq_len, batch, input_size), dtype=jnp.float32)
    h0 = jnp.zeros((batch, hidden_size), jnp.float32)   # reset()

    # ---- single step (module.forward once) ----------------------------------
    y1, h1 = intersection_rnn_cell(xs[0], h0, packed)
    y1, h1 = jax.block_until_ready((y1, h1))
    y1_ref, h1_ref = _reference_step(xs[0], h0, raw_params)
    # bf16 W_top => loosened tolerance vs the f32 reference.
    assert jnp.allclose(y1, y1_ref, atol=2e-2, rtol=2e-2), "single-step y mismatch"
    assert jnp.allclose(h1, h1_ref, atol=2e-2, rtol=2e-2), "single-step h mismatch"

    # ---- full sequence: hoisted x-projection + chunked recurrent kernel -----
    # t_chunk=4 => grid=(2,) exercises the carried hidden state across chunks.
    ys, h_last = intersection_rnn_sequence(xs, packed, h0=h0, t_chunk=4)
    ys, h_last = jax.block_until_ready((ys, h_last))

    ys_ref = []
    h = h0
    for t in range(seq_len):
        y, h = _reference_step(xs[t], h, raw_params)
        ys_ref.append(y)
    ys_ref = jnp.stack(ys_ref)
    assert jnp.allclose(ys, ys_ref, atol=5e-2, rtol=5e-2), "sequence y mismatch"
    assert jnp.allclose(h_last, h, atol=5e-2, rtol=5e-2), "sequence h mismatch"

    print("KERNEL_OK")
</pallas_src>

<mosaic_0001>
module attributes {stable_mosaic.version = 11 : i64} {
  func.func @_cell_kernel(%arg0: memref<8x128xf32, #tpu.memory_space<vmem>>, %arg1: memref<8x128xf32, #tpu.memory_space<vmem>>, %arg2: memref<128x512xbf16, #tpu.memory_space<vmem>>, %arg3: memref<128x512xf32, #tpu.memory_space<vmem>>, %arg4: memref<1x512xf32, #tpu.memory_space<vmem>>, %arg5: memref<8x128xf32, #tpu.memory_space<vmem>>, %arg6: memref<8x128xf32, #tpu.memory_space<vmem>>) attributes {dimension_semantics = [], scalar_prefetch = 0 : i64, scratch_operands = 0 : i64, tpu.core_type = #tpu.core_type<tc>} {
    %c0 = arith.constant 0 : index
    %c0_0 = arith.constant 0 : index
    %0 = vector.load %arg0[%c0, %c0_0] : memref<8x128xf32, #tpu.memory_space<vmem>>, vector<8x128xf32>
    %c0_1 = arith.constant 0 : index
    %c0_2 = arith.constant 0 : index
    %1 = vector.load %arg1[%c0_1, %c0_2] : memref<8x128xf32, #tpu.memory_space<vmem>>, vector<8x128xf32>
    %2 = arith.truncf %0 : vector<8x128xf32> to vector<8x128xbf16>
    %c0_3 = arith.constant 0 : index
    %c0_4 = arith.constant 0 : index
    %3 = vector.load %arg2[%c0_3, %c0_4] : memref<128x512xbf16, #tpu.memory_space<vmem>>, vector<128x512xbf16>
    %cst = arith.constant dense<0.000000e+00> : vector<8x512xf32>
    %4 = tpu.matmul %2, %3, %cst {dimension_numbers = #tpu.dot_dimension_numbers<[1], [0], [0], [1], [0, 0, 1, 1], [], []>} : vector<8x128xbf16>, vector<128x512xbf16>, vector<8x512xf32> -> vector<8x512xf32>
    %c0_5 = arith.constant 0 : index
    %c0_6 = arith.constant 0 : index
    %5 = vector.load %arg3[%c0_5, %c0_6] : memref<128x512xf32, #tpu.memory_space<vmem>>, vector<128x512xf32>
    %cst_7 = arith.constant dense<0.000000e+00> : vector<8x512xf32>
    %6 = tpu.matmul %1, %5, %cst_7 {dimension_numbers = #tpu.dot_dimension_numbers<[1], [0], [0], [1], [0, 0, 1, 1], [], []>} : vector<8x128xf32>, vector<128x512xf32>, vector<8x512xf32> -> vector<8x512xf32>
    %7 = arith.addf %4, %6 : vector<8x512xf32>
    %c0_8 = arith.constant 0 : index
    %c0_9 = arith.constant 0 : index
    %8 = vector.load %arg4[%c0_8, %c0_9] : memref<1x512xf32, #tpu.memory_space<vmem>>, vector<1x512xf32>
    %9 = vector.broadcast %8 : vector<1x512xf32> to vector<8x512xf32>
    %10 = arith.addf %7, %9 : vector<8x512xf32>
    %11 = vector.extract_strided_slice %10 {offsets = [0, 0], sizes = [8, 128], strides = [1, 1]} : vector<8x512xf32> to vector<8x128xf32>
    %12 = math.tanh %11 : vector<8x128xf32>
    %13 = vector.extract_strided_slice %10 {offsets = [0, 128], sizes = [8, 128], strides = [1, 1]} : vector<8x512xf32> to vector<8x128xf32>
    %14 = math.tanh %13 : vector<8x128xf32>
    %15 = vector.extract_strided_slice %10 {offsets = [0, 256], sizes = [8, 128], strides = [1, 1]} : vector<8x512xf32> to vector<8x128xf32>
    %cst_10 = arith.constant 5.000000e-01 : f32
    %16 = vector.broadcast %cst_10 : f32 to vector<8x128xf32>
    %17 = arith.mulf %16, %15 : vector<8x128xf32>
    %18 = math.tanh %17 : vector<8x128xf32>
    %cst_11 = arith.constant 1.000000e+00 : f32
    %19 = vector.broadcast %cst_11 : f32 to vector<8x128xf32>
    %20 = arith.addf %18, %19 : vector<8x128xf32>
    %cst_12 = arith.constant 5.000000e-01 : f32
    %21 = vector.broadcast %cst_12 : f32 to vector<8x128xf32>
    %22 = arith.mulf %21, %20 : vector<8x128xf32>
    %23 = vector.extract_strided_slice %10 {offsets = [0, 384], sizes = [8, 128], strides = [1, 1]} : vector<8x512xf32> to vector<8x128xf32>
    %cst_13 = arith.constant 5.000000e-01 : f32
    %24 = vector.broadcast %cst_13 : f32 to vector<8x128xf32>
    %25 = arith.mulf %24, %23 : vector<8x128xf32>
    %26 = math.tanh %25 : vector<8x128xf32>
    %cst_14 = arith.constant 1.000000e+00 : f32
    %27 = vector.broadcast %cst_14 : f32 to vector<8x128xf32>
    %28 = arith.addf %26, %27 : vector<8x128xf32>
    %cst_15 = arith.constant 5.000000e-01 : f32
    %29 = vector.broadcast %cst_15 : f32 to vector<8x128xf32>
    %30 = arith.mulf %29, %28 : vector<8x128xf32>
    %31 = arith.mulf %22, %0 : vector<8x128xf32>
    %cst_16 = arith.constant 1.000000e+00 : f32
    %32 = vector.broadcast %cst_16 : f32 to vector<8x128xf32>
    %33 = arith.subf %32, %22 : vector<8x128xf32>
    %34 = arith.mulf %33, %12 : vector<8x128xf32>
    %35 = arith.addf %31, %34 : vector<8x128xf32>
    %c0_17 = arith.constant 0 : index
    %c0_18 = arith.constant 0 : index
    %36 = vector.load %arg5[%c0_17, %c0_18] : memref<8x128xf32, #tpu.memory_space<vmem>>, vector<8x128xf32>
    tpu.vector_store %arg5[%c0_17, %c0_18], %35 {strides = array<i32>} : memref<8x128xf32, #tpu.memory_space<vmem>>, vector<8x128xf32>,
    %37 = arith.mulf %30, %1 : vector<8x128xf32>
    %cst_19 = arith.constant 1.000000e+00 : f32
    %38 = vector.broadcast %cst_19 : f32 to vector<8x128xf32>
    %39 = arith.subf %38, %30 : vector<8x128xf32>
    %40 = arith.mulf %39, %14 : vector<8x128xf32>
    %41 = arith.addf %37, %40 : vector<8x128xf32>
    %c0_20 = arith.constant 0 : index
    %c0_21 = arith.constant 0 : index
    %42 = vector.load %arg6[%c0_20, %c0_21] : memref<8x128xf32, #tpu.memory_space<vmem>>, vector<8x128xf32>
    tpu.vector_store %arg6[%c0_20, %c0_21], %41 {strides = array<i32>} : memref<8x128xf32, #tpu.memory_space<vmem>>, vector<8x128xf32>,
    return
  }
}

</mosaic_0001>

<bundles_post_ra>
// kernel: tpu_custom_call.1
= control target key start
LH: loop header
LB: loop body
LE: loop exit
PB: predicated region body
PF: predicated region fallthrough
CT: control target
= control target key end

     0   :  { %12 = vsyncpa [#allocation3], 0  ;;  %s939_s0 = inlined_call_operand.hbm [shape: f32[8,128], index: 0, kind: input, shape index: {}]   ;;  %s940_s1 = inlined_call_operand.hbm [shape: f32[8,128], index: 1, kind: input, shape index: {}]   ;;  %s941_s2 = inlined_call_operand.hbm [shape: bf16[128,512], index: 2, kind: input, shape index: {}]   ;;  %s942_s3 = inlined_call_operand.hbm [shape: f32[128,512], index: 3, kind: input, shape index: {}]   ;;  %s943_s4 = inlined_call_operand.vmem [shape: f32[1,512], index: 4, kind: input, shape index: {}]   ;;  %s944_s5 = inlined_call_operand.hbm [shape: f32[8,128], index: 5, kind: output, shape index: {0}]   ;;  %s945_s6 = inlined_call_operand.hbm [shape: f32[8,128], index: 6, kind: output, shape index: {1}]  }
   0x1   :  { %13 = vsyncpa [#allocation6], 0 }
   0x2   :  { %14 = vsyncpa [#allocation9], 0 }
   0x3   :  { %15 = vsyncpa [#allocation4], 0 }
   0x4   :  { %16 = vsyncpa [#allocation12], 0  ;;  %s866_s21 = smov [#allocation5]   ;;  %s867_s23 = smov [#allocation2]  }
   0x5   :  { %s33_s22 = sshll.u32 %s866_s21, 4  ;;  %s23_s24 = sshll.u32 %s867_s23, 4  ;;  %s34_s22 = int_to_ptr.vmem [resolvable:$true] %s33_s22  ;;  %s24_s24 = int_to_ptr.vmem [resolvable:$true] %s23_s24 }
   0x6   :  { %s744_s25 = scalar_lea.vmem %s34_s22, 128  ;;  %p749_p1 = scmp.lt.s32.totalorder %s34_s22, %s34_s22 }
   0x7   :  { %p745_p0 = scmp.ne.s32.totalorder %s34_s22, %s744_s25  ;;  %p750_p2 = scmp.lt.s32.totalorder %s744_s25, %s744_s25 }
   0x9   :  { %p751_p3 = por %p750_p2, %p749_p1 }
   0xb   :  { %p752_p4 = pnand %p751_p3, %p745_p0 }
   0xd   :  { %755 = shalt.err (!%p752_p4)
}
   0xe   :  { %36 = dma.hbm_to_vmem [thread:$0]  %s940_s1, 128, %s34_s22, [#allocation6]  }
   0xf   :  { %s764_s28 = scalar_lea.vmem %s24_s24, 128  ;;  %p769_p6 = scmp.lt.s32.totalorder %s24_s24, %s24_s24 }
  0x10   :  { %p765_p5 = scmp.ne.s32.totalorder %s24_s24, %s764_s28  ;;  %p770_p7 = scmp.lt.s32.totalorder %s764_s28, %s764_s28 }
  0x12   :  { %p771_p8 = por %p770_p7, %p769_p6 }
  0x14   :  { %p772_p9 = pnand %p771_p8, %p765_p5 }
  0x16   :  { %775 = shalt.err (!%p772_p9)
}
  0x17   :  { %26 = dma.hbm_to_vmem [thread:$0]  %s939_s0, 128, %s24_s24, [#allocation3]  }
  0x18   :  { %s868_s7 = smov [#allocation7]  }
  0x19   :  { %s42_s8 = sshll.u32 %s868_s7, 4  ;;  %s43_s8 = int_to_ptr.vmem [resolvable:$true] %s42_s8 }
  0x1a   :  { %s784_s9 = scalar_lea.vmem %s43_s8, 4096  ;;  %p789_p11 = scmp.lt.s32.totalorder %s43_s8, %s43_s8 }
  0x1b   :  { %p785_p10 = scmp.ne.s32.totalorder %s43_s8, %s784_s9  ;;  %p790_p12 = scmp.lt.s32.totalorder %s784_s9, %s784_s9 }
  0x1d   :  { %p791_p13 = por %p790_p12, %p789_p11 }
  0x1f   :  { %p792_p0 = pnand %p791_p13, %p785_p10 }
  0x21   :  { %795 = shalt.err (!%p792_p0)
}
  0x22   :  { %s869_s1 = smov 256   ;;  %s870_s10 = smov 16  }
  0x23   :  { %48 = dma.hbm_to_vmem [thread:$0]  %s941_s2, 4096, %s43_s8, [#allocation6], %s869_s1, %s869_s1, %s870_s10  }
  0x24   :  { %s871_s13 = smov [#allocation8]  }
  0x25   :  { %s54_s14 = sshll.u32 %s871_s13, 4  ;;  %s55_s14 = int_to_ptr.vmem [resolvable:$true] %s54_s14 }
  0x26   :  { %s804_s0 = scalar_lea.vmem %s55_s14, 8192  ;;  %p809_p2 = scmp.lt.s32.totalorder %s55_s14, %s55_s14 }
  0x27   :  { %p805_p1 = scmp.ne.s32.totalorder %s55_s14, %s804_s0  ;;  %p810_p3 = scmp.lt.s32.totalorder %s804_s0, %s804_s0 }
  0x29   :  { %p811_p4 = por %p810_p3, %p809_p2 }
  0x2b   :  { %p812_p5 = pnand %p811_p4, %p805_p1 }
  0x2d   :  { %815 = shalt.err (!%p812_p5)
}
  0x2e   :  { %s872_s15 = smov 512   ;;  %s873_s16 = smov 32  }
  0x2f   :  { %60 = dma.hbm_to_vmem [thread:$0]  %s942_s3, 8192, %s55_s14, [#allocation9], %s872_s15, %s872_s15, %s873_s16  }
  0x30   :  { %856 = dma.done.wait [#allocation3], 128  }
  0x31   :  { %857 = vsyncadd [#allocation3], 4294967168 }
  0x32   :  { %858 = dma.done.wait [#allocation6], 4224  }
  0x33   :  { %859 = vsyncadd [#allocation6], 4294963072 }
  0x34   :  { %860 = dma.done.wait [#allocation9], 8192  }
  0x35   :  { %861 = vsyncadd [#allocation9], 4294959104  ;;  %v874_v0 = vmov 0.0   ;;  %v172_v1 = vld [vmem:[#allocation8 + $0x1e8] sm:$0xff]  ;;  %v174_v2 = vld [vmem:[#allocation8 + $0x1f8] sm:$0xff]  ;;  %s877_s20 = smov [#allocation11]  }
  0x36   :  { %310 = vmatprep.mubr.f32.mxu1 %v874_v0  ;;  %239 = vmatprep.mubr.f32.mxu0 %v874_v0  ;;  %v171_v3 = vld [vmem:[#allocation8 + $0x1e0] sm:$0xff]  ;;  %v173_v4 = vld [vmem:[#allocation8 + $0x1f0] sm:$0xff]  ;;  %v168_v5 = vld [vmem:[#allocation8 + $0x1c8] sm:$0xff]  ;;  %s621_s21 = sshll.u32 %s877_s20, 4  ;;  %s622_s21 = int_to_ptr.vmem [resolvable:$true] %s621_s21 }
  0x37   :  { %175 = vmatprep.subr.mxu0 %v172_v1  ;;  %246 = vmatprep.subr.mxu1 %v174_v2  ;;  %v170_v6 = vld [vmem:[#allocation8 + $0x1d8] sm:$0xff]  ;;  %v167_v7 = vld [vmem:[#allocation8 + $0x1c0] sm:$0xff]  ;;  %v169_v8 = vld [vmem:[#allocation8 + $0x1d0] sm:$0xff] }
  0x38   :  { %176 = vmatpush1.msra.mxu0 %v171_v3  ;;  %247 = vmatpush1.msra.mxu1 %v173_v4  ;;  %v164_v9 = vld [vmem:[#allocation8 + $0x1a8] sm:$0xff]  ;;  %v166_v10 = vld [vmem:[#allocation8 + $0x1b8] sm:$0xff]  ;;  %v163_v11 = vld [vmem:[#allocation8 + $0x1a0] sm:$0xff] }
  0x39   :  { %177 = vmatprep.subr.mxu0 %v168_v5  ;;  %248 = vmatprep.subr.mxu1 %v170_v6  ;;  %v165_v12 = vld [vmem:[#allocation8 + $0x1b0] sm:$0xff]  ;;  %v160_v13 = vld [vmem:[#allocation8 + $0x188] sm:$0xff]  ;;  %v162_v14 = vld [vmem:[#allocation8 + $0x198] sm:$0xff] }
  0x3a   :  { %178 = vmatpush1.msra.mxu0 %v167_v7  ;;  %249 = vmatpush1.msra.mxu1 %v169_v8  ;;  %v159_v15 = vld [vmem:[#allocation8 + $0x180] sm:$0xff]  ;;  %v161_v16 = vld [vmem:[#allocation8 + $0x190] sm:$0xff]  ;;  %v156_v17 = vld [vmem:[#allocation8 + $0x168] sm:$0xff] }
  0x3b   :  { %179 = vmatprep.subr.mxu0 %v164_v9  ;;  %250 = vmatprep.subr.mxu1 %v166_v10  ;;  %v158_v18 = vld [vmem:[#allocation8 + $0x178] sm:$0xff]  ;;  %v155_v19 = vld [vmem:[#allocation8 + $0x160] sm:$0xff]  ;;  %v157_v20 = vld [vmem:[#allocation8 + $0x170] sm:$0xff] }
  0x3c   :  { %180 = vmatpush1.msra.mxu0 %v163_v11  ;;  %251 = vmatpush1.msra.mxu1 %v165_v12  ;;  %v152_v21 = vld [vmem:[#allocation8 + $0x148] sm:$0xff]  ;;  %v154_v22 = vld [vmem:[#allocation8 + $0x158] sm:$0xff]  ;;  %v151_v23 = vld [vmem:[#allocation8 + $0x140] sm:$0xff]  ;;  %v875_v12 = vmov 0  }
  0x3d   :  { %181 = vmatprep.subr.mxu0 %v160_v13  ;;  %252 = vmatprep.subr.mxu1 %v162_v14  ;;  %v153_v24 = vld [vmem:[#allocation8 + $0x150] sm:$0xff]  ;;  %v148_v25 = vld [vmem:[#allocation8 + $0x128] sm:$0xff]  ;;  %v150_v26 = vld [vmem:[#allocation8 + $0x138] sm:$0xff] }
  0x3e   :  { %182 = vmatpush1.msra.mxu0 %v159_v15  ;;  %253 = vmatpush1.msra.mxu1 %v161_v16  ;;  %v147_v27 = vld [vmem:[#allocation8 + $0x120] sm:$0xff]  ;;  %v149_v28 = vld [vmem:[#allocation8 + $0x130] sm:$0xff]  ;;  %v144_v29 = vld [vmem:[#allocation8 + $0x108] sm:$0xff] }
  0x3f   :  { %183 = vmatprep.subr.mxu0 %v156_v17  ;;  %254 = vmatprep.subr.mxu1 %v158_v18  ;;  %v146_v30 = vld [vmem:[#allocation8 + $0x118] sm:$0xff]  ;;  %v143_v31 = vld [vmem:[#allocation8 + $0x100] sm:$0xff]  ;;  %v145_v32 = vld [vmem:[#allocation8 + $0x110] sm:$0xff] }
  0x40   :  { %184 = vmatpush1.msra.mxu0 %v155_v19  ;;  %255 = vmatpush1.msra.mxu1 %v157_v20  ;;  %v140_v33 = vld [vmem:[#allocation8 + $0xe8] sm:$0xff]  ;;  %v142_v34 = vld [vmem:[#allocation8 + $0xf8] sm:$0xff]  ;;  %v139_v35 = vld [vmem:[#allocation8 + $0xe0] sm:$0xff] }
  0x41   :  { %185 = vmatprep.subr.mxu0 %v152_v21  ;;  %256 = vmatprep.subr.mxu1 %v154_v22  ;;  %v141_v36 = vld [vmem:[#allocation8 + $0xf0] sm:$0xff]  ;;  %v136_v37 = vld [vmem:[#allocation8 + $0xc8] sm:$0xff]  ;;  %v138_v38 = vld [vmem:[#allocation8 + $0xd8] sm:$0xff] }
  0x42   :  { %186 = vmatpush1.msra.mxu0 %v151_v23  ;;  %257 = vmatpush1.msra.mxu1 %v153_v24  ;;  %v135_v39 = vld [vmem:[#allocation8 + $0xc0] sm:$0xff]  ;;  %v137_v40 = vld [vmem:[#allocation8 + $0xd0] sm:$0xff]  ;;  %v132_v41 = vld [vmem:[#allocation8 + $0xa8] sm:$0xff] }
  0x43   :  { %187 = vmatprep.subr.mxu0 %v148_v25  ;;  %258 = vmatprep.subr.mxu1 %v150_v26  ;;  %v134_v42 = vld [vmem:[#allocation8 + $0xb8] sm:$0xff]  ;;  %v131_v43 = vld [vmem:[#allocation8 + $0xa0] sm:$0xff]  ;;  %v133_v44 = vld [vmem:[#allocation8 + $0xb0] sm:$0xff] }
  0x44   :  { %188 = vmatpush1.msra.mxu0 %v147_v27  ;;  %259 = vmatpush1.msra.mxu1 %v149_v28  ;;  %v128_v45 = vld [vmem:[#allocation8 + $0x88] sm:$0xff]  ;;  %v130_v46 = vld [vmem:[#allocation8 + $0x98] sm:$0xff]  ;;  %v127_v47 = vld [vmem:[#allocation8 + $0x80] sm:$0xff] }
  0x45   :  { %189 = vmatprep.subr.mxu0 %v144_v29  ;;  %260 = vmatprep.subr.mxu1 %v146_v30  ;;  %v129_v48 = vld [vmem:[#allocation8 + $0x90] sm:$0xff]  ;;  %v124_v49 = vld [vmem:[#allocation8 + $0x68] sm:$0xff]  ;;  %v126_v50 = vld [vmem:[#allocation8 + $0x78] sm:$0xff] }
  0x46   :  { %190 = vmatpush1.msra.mxu0 %v143_v31  ;;  %261 = vmatpush1.msra.mxu1 %v145_v32  ;;  %v123_v51 = vld [vmem:[#allocation8 + $0x60] sm:$0xff]  ;;  %v125_v52 = vld [vmem:[#allocation8 + $0x70] sm:$0xff]  ;;  %v120_v53 = vld [vmem:[#allocation8 + $0x48] sm:$0xff] }
  0x47   :  { %191 = vmatprep.subr.mxu0 %v140_v33  ;;  %262 = vmatprep.subr.mxu1 %v142_v34  ;;  %v122_v54 = vld [vmem:[#allocation8 + $0x58] sm:$0xff]  ;;  %v119_v55 = vld [vmem:[#allocation8 + $0x40] sm:$0xff]  ;;  %v121_v56 = vld [vmem:[#allocation8 + $0x50] sm:$0xff] }
  0x48   :  { %192 = vmatpush1.msra.mxu0 %v139_v35  ;;  %263 = vmatpush1.msra.mxu1 %v141_v36  ;;  %v116_v57 = vld [vmem:[#allocation8 + $0x28] sm:$0xff]  ;;  %v118_v58 = vld [vmem:[#allocation8 + $0x38] sm:$0xff]  ;;  %v115_v59 = vld [vmem:[#allocation8 + $0x20] sm:$0xff] }
  0x49   :  { %193 = vmatprep.subr.mxu0 %v136_v37  ;;  %264 = vmatprep.subr.mxu1 %v138_v38  ;;  %v117_v60 = vld [vmem:[#allocation8 + $0x30] sm:$0xff]  ;;  %v112_v61 = vld [vmem:[#allocation8 + $0x8] sm:$0xff]  ;;  %v114_v62 = vld [vmem:[#allocation8 + $0x18] sm:$0xff]  ;;  %v561_v37 = vlaneseq }
  0x4a   :  { %194 = vmatpush1.msra.mxu0 %v135_v39  ;;  %265 = vmatpush1.msra.mxu1 %v137_v40  ;;  %v111_v63 = vld [vmem:[#allocation8] sm:$0xff]  ;;  %v113_v0 = vld [vmem:[#allocation8 + $0x10] sm:$0xff]  ;;  %v925_v1 = vld [vmem:[#allocation5] sm:$0xff] }
  0x4b   :  { %195 = vmatprep.subr.mxu0 %v132_v41  ;;  %266 = vmatprep.subr.mxu1 %v134_v42  ;;  %v680_v2 = vld [vmem:[#allocation7 + $0xe0] ss:$16 sps:$4 sm:$0xff]   ;;  %v682_v3 = vld [vmem:[#allocation7 + $0xe4] ss:$16 sps:$4 sm:$0xff]   ;;  %v683_v4 = vld [vmem:[#allocation7 + $0xe8] ss:$16 sps:$4 sm:$0xff]  }
  0x4c   :  { %196 = vmatpush1.msra.mxu0 %v131_v43  ;;  %267 = vmatpush1.msra.mxu1 %v133_v44  ;;  %v685_v5 = vld [vmem:[#allocation7 + $0xec] ss:$16 sps:$4 sm:$0xff]   ;;  %v688_v6 = vld [vmem:[#allocation7 + $0xc4] ss:$16 sps:$4 sm:$0xff]   ;;  %v686_v8 = vld [vmem:[#allocation7 + $0xc0] ss:$16 sps:$4 sm:$0xff]  }
  0x4d   :  { %197 = vmatprep.subr.mxu0 %v128_v45  ;;  %268 = vmatprep.subr.mxu1 %v130_v46  ;;  %v691_v7 = vld [vmem:[#allocation7 + $0xcc] ss:$16 sps:$4 sm:$0xff]   ;;  %v689_v9 = vld [vmem:[#allocation7 + $0xc8] ss:$16 sps:$4 sm:$0xff]   ;;  %v694_v10 = vld [vmem:[#allocation7 + $0xa4] ss:$16 sps:$4 sm:$0xff]  }
  0x4e   :  { %198 = vmatpush1.msra.mxu0 %v127_v47  ;;  %269 = vmatpush1.msra.mxu1 %v129_v48  ;;  %v697_v11 = vld [vmem:[#allocation7 + $0xac] ss:$16 sps:$4 sm:$0xff]   ;;  %v692_v13 = vld [vmem:[#allocation7 + $0xa0] ss:$16 sps:$4 sm:$0xff]   ;;  %v695_v14 = vld [vmem:[#allocation7 + $0xa8] ss:$16 sps:$4 sm:$0xff]  }
  0x4f   :  { %199 = vmatprep.subr.mxu0 %v124_v49  ;;  %270 = vmatprep.subr.mxu1 %v126_v50  ;;  %v700_v15 = vld [vmem:[#allocation7 + $0x84] ss:$16 sps:$4 sm:$0xff]   ;;  %v703_v16 = vld [vmem:[#allocation7 + $0x8c] ss:$16 sps:$4 sm:$0xff]   ;;  %v698_v17 = vld [vmem:[#allocation7 + $0x80] ss:$16 sps:$4 sm:$0xff]  }
  0x50   :  { %200 = vmatpush1.msra.mxu0 %v123_v51  ;;  %271 = vmatpush1.msra.mxu1 %v125_v52  ;;  %v701_v18 = vld [vmem:[#allocation7 + $0x88] ss:$16 sps:$4 sm:$0xff]   ;;  %v706_v19 = vld [vmem:[#allocation7 + $0x64] ss:$16 sps:$4 sm:$0xff]   ;;  %v709_v20 = vld [vmem:[#allocation7 + $0x6c] ss:$16 sps:$4 sm:$0xff]  }
  0x51   :  { %201 = vmatprep.subr.mxu0 %v120_v53  ;;  %272 = vmatprep.subr.mxu1 %v122_v54  ;;  %v704_v21 = vld [vmem:[#allocation7 + $0x60] ss:$16 sps:$4 sm:$0xff]   ;;  %v707_v22 = vld [vmem:[#allocation7 + $0x68] ss:$16 sps:$4 sm:$0xff]   ;;  %v712_v23 = vld [vmem:[#allocation7 + $0x44] ss:$16 sps:$4 sm:$0xff]  }
  0x52   :  { %202 = vmatpush1.msra.mxu0 %v119_v55  ;;  %273 = vmatpush1.msra.mxu1 %v121_v56  ;;  %v715_v24 = vld [vmem:[#allocation7 + $0x4c] ss:$16 sps:$4 sm:$0xff]   ;;  %v710_v25 = vld [vmem:[#allocation7 + $0x40] ss:$16 sps:$4 sm:$0xff]   ;;  %v713_v26 = vld [vmem:[#allocation7 + $0x48] ss:$16 sps:$4 sm:$0xff]  }
  0x53   :  { %203 = vmatprep.subr.mxu0 %v116_v57  ;;  %274 = vmatprep.subr.mxu1 %v118_v58  ;;  %v718_v27 = vld [vmem:[#allocation7 + $0x24] ss:$16 sps:$4 sm:$0xff]   ;;  %v721_v28 = vld [vmem:[#allocation7 + $0x2c] ss:$16 sps:$4 sm:$0xff]   ;;  %v716_v29 = vld [vmem:[#allocation7 + $0x20] ss:$16 sps:$4 sm:$0xff]  }
  0x54   :  { %204 = vmatpush1.msra.mxu0 %v115_v59  ;;  %275 = vmatpush1.msra.mxu1 %v117_v60  ;;  %v719_v30 = vld [vmem:[#allocation7 + $0x28] ss:$16 sps:$4 sm:$0xff]   ;;  %v724_v31 = vld [vmem:[#allocation7 + $0x4] ss:$16 sps:$4 sm:$0xff]   ;;  %v727_v32 = vld [vmem:[#allocation7 + $0xc] ss:$16 sps:$4 sm:$0xff]  }
  0x55   :  { %205 = vmatprep.subr.mxu0 %v112_v61  ;;  %276 = vmatprep.subr.mxu1 %v114_v62  ;;  %v722_v33 = vld [vmem:[#allocation7] ss:$16 sps:$4 sm:$0xff]   ;;  %v725_v34 = vld [vmem:[#allocation7 + $0x8] ss:$16 sps:$4 sm:$0xff]   ;;  %v562_v38 = vshrl.u32 %v561_v37, 7 }
  0x56   :  { %206 = vmatpush1.msra.mxu0 %v111_v63  ;;  %277 = vmatpush1.msra.mxu1 %v113_v0  ;;  %v76_v35 = vld [vmem:[#allocation2] sm:$0xff] }
  0x57   :  { %311 = vmatmul.mubr.f32.vlgmr.msra.gmra.mxu1 %v925_v1  ;;  %477 = vmatprep.subr.bf16.mxu0 %v682_v3  ;;  %v78_v36 = vpack.c.bf16 %v76_v35, %v76_v35  ;;  %v571_v41 = vsub.s32 2, %v562_v38  ;;  %v559_v42 = vld [vmem:[%s943_s4] sm:$0xf]  ;;  %v575_v43 = vsub.s32 3, %v562_v38  ;;  %v563_v49 = vsub.s32 0, %v562_v38  ;;  %s876_s4 = smov [#allocation10]  }
  0x58   :  { %518 = vmatprep.subr.bf16.mxu1 %v685_v5  ;;  %240 = vmatmul.mubr.f32.vlgmr.msra.gmra.mxu0 %v925_v1  ;;  %v567_v55 = vsub.s32 1, %v562_v38  ;;  %s611_s19 = sshll.u32 %s876_s4, 4  ;;  %s612_s19 = int_to_ptr.vmem [resolvable:$true] %s611_s19 }
  0x59   :  { %478 = vmatpush1.bf16.msra.mxu0 %v680_v2  ;;  %519 = vmatpush1.bf16.msra.mxu1 %v683_v4  ;;  %v572_v46 = vrot.slane %v559_v42, %v571_v41  ;;  %v576_v51 = vrot.slane %v559_v42, %v575_v43  ;;  %v564_v60 = vrot.slane %v559_v42, %v563_v49  ;;  %s816_s22 = scalar_lea.vmem %s612_s19, 128  ;;  %p821_p7 = scmp.lt.s32.totalorder %s612_s19, %s612_s19 }
  0x5a   :  { %479 = vmatprep.subr.bf16.mxu0 %v688_v6  ;;  %520 = vmatprep.subr.bf16.mxu1 %v691_v7  ;;  %v568_v3 = vrot.slane %v559_v42, %v567_v55  ;;  %p817_p6 = scmp.ne.s32.totalorder %s612_s19, %s816_s22  ;;  %p822_p8 = scmp.lt.s32.totalorder %s816_s22, %s816_s22 }
  0x5b   :  { %509 = vmatprep.mubr.bf16.mxu0 %v875_v12  ;;  %550 = vmatprep.mubr.bf16.mxu1 %v875_v12 }
  0x5c   :  { %p823_p9 = por %p822_p8, %p821_p7 }
  0x5d   :  { %480 = vmatpush1.bf16.msra.mxu0 %v686_v8  ;;  %521 = vmatpush1.bf16.msra.mxu1 %v689_v9 }
  0x5e   :  { %481 = vmatprep.subr.bf16.mxu0 %v694_v10  ;;  %522 = vmatprep.subr.bf16.mxu1 %v697_v11  ;;  %p824_p10 = pnand %p823_p9, %p817_p6 }
  0x61   :  { %482 = vmatpush1.bf16.msra.mxu0 %v692_v13  ;;  %523 = vmatpush1.bf16.msra.mxu1 %v695_v14 }
  0x62   :  { %483 = vmatprep.subr.bf16.mxu0 %v700_v15  ;;  %524 = vmatprep.subr.bf16.mxu1 %v703_v16 }
  0x65   :  { %484 = vmatpush1.bf16.msra.mxu0 %v698_v17  ;;  %525 = vmatpush1.bf16.msra.mxu1 %v701_v18 }
  0x66   :  { %485 = vmatprep.subr.bf16.mxu0 %v706_v19  ;;  %526 = vmatprep.subr.bf16.mxu1 %v709_v20 }
  0x69   :  { %486 = vmatpush1.bf16.msra.mxu0 %v704_v21  ;;  %527 = vmatpush1.bf16.msra.mxu1 %v707_v22 }
  0x6a   :  { %487 = vmatprep.subr.bf16.mxu0 %v712_v23  ;;  %528 = vmatprep.subr.bf16.mxu1 %v715_v24 }
  0x6d   :  { %488 = vmatpush1.bf16.msra.mxu0 %v710_v25  ;;  %529 = vmatpush1.bf16.msra.mxu1 %v713_v26 }
  0x6e   :  { %489 = vmatprep.subr.bf16.mxu0 %v718_v27  ;;  %530 = vmatprep.subr.bf16.mxu1 %v721_v28 }
  0x71   :  { %490 = vmatpush1.bf16.msra.mxu0 %v716_v29  ;;  %531 = vmatpush1.bf16.msra.mxu1 %v719_v30 }
  0x72   :  { %491 = vmatprep.subr.bf16.mxu0 %v724_v31  ;;  %532 = vmatprep.subr.bf16.mxu1 %v727_v32 }
  0x75   :  { %492 = vmatpush1.bf16.msra.mxu0 %v722_v33  ;;  %533 = vmatpush1.bf16.msra.mxu1 %v725_v34 }
  0x78   :  { %510 = vmatmul.mubr.bf16.vlgmr.msra.gmra.mxu0 %v78_v36  ;;  %551 = vmatmul.mubr.bf16.vlgmr.msra.gmra.mxu1 %v78_v36 }
 0x117   :  { %v312_v39 = vpop.f32.mrf.mxu1 }
 0x118   :  { %v241_v40 = vpop.f32.mrf.mxu0 }
 0x119   :  { %v314_v44 = vpop.f32.mrf.mxu1 }
 0x11a   :  { %v243_v45 = vpop.f32.mrf.mxu0 }
 0x138   :  { %v511_v47 = vpop.f32.mrf.mxu0  ;;  %v552_v48 = vpop.f32.mrf.mxu1 }
 0x139   :  { %v553_v50 = vadd.f32 %v552_v48, %v312_v39  ;;  %v512_v59 = vadd.f32 %v511_v47, %v241_v40 }
 0x13a   :  { %v513_v52 = vpop.f32.mrf.mxu0  ;;  %v554_v53 = vpop.f32.mrf.mxu1 }
 0x13b   :  { %v583_v54 = vadd.f32 %v572_v46, %v553_v50  ;;  %v555_v56 = vadd.f32 %v554_v53, %v314_v44  ;;  %v514_v2 = vadd.f32 %v513_v52, %v243_v45  ;;  %v581_v5 = vadd.f32 %v564_v60, %v512_v59 }
 0x13c   :  { %v556_v57 = vpop.f32.mrf.mxu1  ;;  %v515_v58 = vpop.f32.mrf.mxu0 }
 0x13d   :  { %v587_v61 = vmul.f32 0.5, %v583_v54  ;;  %v584_v62 = vadd.f32 %v576_v51, %v555_v56  ;;  %v582_v6 = vadd.f32 %v568_v3, %v514_v2 }
 0x13e   :  { %v557_v63 = vpop.f32.mrf.mxu1  ;;  %v516_v0 = vpop.f32.mrf.mxu0 }
 0x13f   :  { %728 = vtanh.f32 %v587_v61  ;;  %v591_v4 = vmul.f32 0.5, %v584_v62 }
 0x141   :  { %730 = vtanh.f32 %v591_v4 }
 0x142   :  { %732 = vtanh.f32 %v581_v5 }
 0x143   :  { %734 = vtanh.f32 %v582_v6 }
 0x14c   :  { %v729_v7 = vpop.eup %728 }
 0x14d   :  { %v589_v8 = vadd.f32 1.0, %v729_v7 }
 0x14e   :  { %v731_v9 = vpop.eup %730 }
 0x14f   :  { %v590_v10 = vmul.f32 0.5, %v589_v8  ;;  %v593_v11 = vadd.f32 1.0, %v731_v9  ;;  %v733_v14 = vpop.eup %732 }
 0x150   :  { %v735_v18 = vpop.eup %734 }
 0x151   :  { %v594_v12 = vmul.f32 0.5, %v593_v11  ;;  %v596_v13 = vsub.f32 1.0, %v590_v10  ;;  %v595_v15 = vmul.f32 %v590_v10, %v76_v35 }
 0x153   :  { %v597_v16 = vmul.f32 %v733_v14, %v596_v13  ;;  %v601_v17 = vsub.f32 1.0, %v594_v12  ;;  %v600_v20 = vmul.f32 %v594_v12, %v925_v1 }
 0x155   :  { %v598_v19 = vadd.f32 %v597_v16, %v595_v15  ;;  %v602_v21 = vmul.f32 %v735_v18, %v601_v17 }
 0x157   :  { %599 = vst [vmem:[#allocation10] sm:$0xff] %v598_v19  ;;  %v603_v22 = vadd.f32 %v602_v21, %v600_v20 }
 0x158   :  { %827 = shalt.err (!%p824_p10)
}
 0x159   :  { %614 = dma.vmem_to_hbm [thread:$0]  %s612_s19, 128, %s944_s5, [#allocation4]   ;;  %604 = vst [vmem:[#allocation11] sm:$0xff] %v603_v22 }
 0x15a   :  { %s836_s25 = scalar_lea.vmem %s622_s21, 128  ;;  %p841_p12 = scmp.lt.s32.totalorder %s622_s21, %s622_s21 }
 0x15b   :  { %p837_p11 = scmp.ne.s32.totalorder %s622_s21, %s836_s25  ;;  %p842_p13 = scmp.lt.s32.totalorder %s836_s25, %s836_s25 }
 0x15d   :  { %p843_p0 = por %p842_p13, %p841_p12 }
 0x15f   :  { %p844_p1 = pnand %p843_p0, %p837_p11 }
 0x161   :  { %847 = shalt.err (!%p844_p1)
}
 0x162   :  { %624 = dma.vmem_to_hbm [thread:$0]  %s622_s21, 128, %s945_s6, [#allocation12]  }
 0x163   :  { %862 = dma.done.wait [#allocation4], 128  }
 0x164   :  { %863 = vsyncadd [#allocation4], 4294967168 }
 0x165   :  { %864 = dma.done.wait [#allocation12], 128  }
 0x166   :  { %865 = vsyncadd [#allocation12], 4294967168 }
 0x167   :  { %631 = vsyncpa [#allocation3], 1 }
 0x168   :  { %632 = vsyncpa [#allocation6], 1 }
 0x169   :  { %633 = vsyncpa [#allocation9], 1 }
 0x16a   :  { %634 = vsyncpa [#allocation4], 1 }
 0x16b   :  { %635 = vsyncpa [#allocation12], 1 }

</bundles_post_ra>
